<compile_context>
chip_gen: v5e
topology: v5e:2x2
jax: 0.10.0
libtpu: 0.0.40
codegen_flags: <defaults>
</compile_context>

<pallas_src>
import math
import functools

import jax
import jax.numpy as jnp
from jax.experimental import pallas as pl
from jax.experimental.pallas import tpu as pltpu


def mha_kernel(q_ref, k_ref, v_ref, wq_ref, wk_ref, wv_ref, wo_ref,
               g_ref, b_ref, out_ref, att_ref, att_acc, *,
               head_num, eps, batch):
    b = pl.program_id(0)

    @pl.when(b == 0)
    def _init():
        att_acc[...] = jnp.zeros_like(att_acc)

    x_q = q_ref[0]                          # (S, F) f32 — also the residual
    S, F = x_q.shape
    H = head_num
    dh = F // H
    scale = 1.0 / math.sqrt(dh)

    # --- Linear projections: bf16 MXU operands, f32 accumulation -----------
    Q = jnp.dot(x_q.astype(jnp.bfloat16), wq_ref[...],
                preferred_element_type=jnp.float32)          # (S, F) f32
    K = jnp.dot(k_ref[0].astype(jnp.bfloat16), wk_ref[...],
                preferred_element_type=jnp.float32)
    V = jnp.dot(v_ref[0].astype(jnp.bfloat16), wv_ref[...],
                preferred_element_type=jnp.float32)

    # Apply 1/sqrt(dh) once to Q instead of per-head (S,S) score tiles.
    Q = Q * scale

    # --- Head-batched attention on (H, S, dh) tiles -------------------------
    Qh = jnp.transpose(Q.reshape(S, H, dh), (1, 0, 2)).astype(jnp.bfloat16)
    Kh = jnp.transpose(K.reshape(S, H, dh), (1, 0, 2)).astype(jnp.bfloat16)
    Vh = jnp.transpose(V.reshape(S, H, dh), (1, 0, 2)).astype(jnp.bfloat16)

    scores = jnp.einsum('hsd,htd->hst', Qh, Kh,
                        preferred_element_type=jnp.float32)  # (H, S, S) f32
    scores = scores - jnp.max(scores, axis=-1, keepdims=True)
    e = jnp.exp(scores)
    inv_den = pl.reciprocal(jnp.sum(e, axis=-1, keepdims=True), approx=True)
    att = e * inv_den                                        # softmax(dim=-1)

    # Accumulate the attention-map mean numerator across heads and batch.
    att_acc[...] += jnp.sum(att, axis=0)

    ctx = jnp.einsum('hst,htd->hsd', att.astype(jnp.bfloat16), Vh,
                     preferred_element_type=jnp.float32)     # (H, S, dh) f32

    # Merge heads back (== _reshape_from_batches) and project with a full-F
    # contraction on the MXU.
    ctx2 = jnp.transpose(ctx, (1, 0, 2)).reshape(S, F)
    o = jnp.dot(ctx2.astype(jnp.bfloat16), wo_ref[...],
                preferred_element_type=jnp.float32)          # (S, F) f32
    # dropout is identity at inference time.

    # --- Residual + LayerNorm (f32, eps=1e-5, biased variance) --------------
    y = o + x_q
    mean = jnp.mean(y, axis=-1, keepdims=True)
    var = jnp.mean((y - mean) ** 2, axis=-1, keepdims=True)
    yn = (y - mean) * jax.lax.rsqrt(var + eps)
    out_ref[0] = yn * g_ref[...] + b_ref[...]                # (1,F) broadcasts

    @pl.when(b == pl.num_programs(0) - 1)
    def _finalize():
        # torch.mean(att, dim=0) over the (B*H, S, S) stack.
        att_ref[...] = att_acc[...] * (1.0 / (batch * head_num))


def multi_head_attention(q, k, v, wq, wk, wv, wo, gamma, beta,
                         head_num, eps=1e-5):
    B, S, F = q.shape
    kernel = functools.partial(mha_kernel, head_num=head_num, eps=eps, batch=B)

    # Pre-transposed bf16 weights (y = x @ W^T). bf16 keeps the MXU on its
    # native datapath (v6e/v7x) and halves weight VMEM/HBM footprint;
    # accumulation stays f32 inside the kernel.
    wq_t = wq.T.astype(jnp.bfloat16)
    wk_t = wk.T.astype(jnp.bfloat16)
    wv_t = wv.T.astype(jnp.bfloat16)
    wo_t = wo.T.astype(jnp.bfloat16)
    g2 = gamma.reshape(1, F).astype(jnp.float32)
    b2 = beta.reshape(1, F).astype(jnp.float32)

    out, att_mean = pl.pallas_call(
        kernel,
        out_shape=(
            jax.ShapeDtypeStruct((B, S, F), jnp.float32),
            jax.ShapeDtypeStruct((S, S), jnp.float32),   # single mean map
        ),
        grid_spec=pltpu.PrefetchScalarGridSpec(
            num_scalar_prefetch=0,
            grid=(B,),
            in_specs=[
                pl.BlockSpec((1, S, F), lambda b: (b, 0, 0)),   # q
                pl.BlockSpec((1, S, F), lambda b: (b, 0, 0)),   # k
                pl.BlockSpec((1, S, F), lambda b: (b, 0, 0)),   # v
                pl.BlockSpec((F, F), lambda b: (0, 0)),         # Wq^T (bf16)
                pl.BlockSpec((F, F), lambda b: (0, 0)),         # Wk^T (bf16)
                pl.BlockSpec((F, F), lambda b: (0, 0)),         # Wv^T (bf16)
                pl.BlockSpec((F, F), lambda b: (0, 0)),         # Wo^T (bf16)
                pl.BlockSpec((1, F), lambda b: (0, 0)),         # gamma
                pl.BlockSpec((1, F), lambda b: (0, 0)),         # beta
            ],
            out_specs=[
                pl.BlockSpec((1, S, F), lambda b: (b, 0, 0)),   # context
                pl.BlockSpec((S, S), lambda b: (0, 0)),         # att mean (resident)
            ],
            scratch_shapes=[pltpu.VMEM((S, S), jnp.float32)],   # att accumulator
        ),
        compiler_params=pltpu.CompilerParams(
            # Batch axis carries the attention-map accumulator, so it must be
            # "arbitrary" (not "parallel"). At realistic F/S, add a parallel
            # query-tile grid axis and re-size vmem_limit_bytes per chip.
            dimension_semantics=("arbitrary",),
            vmem_limit_bytes=32 * 1024 * 1024,
        ),
    )(q, k, v, wq_t, wk_t, wv_t, wo_t, g2, b2)

    return out, att_mean


if __name__ == "__main__":
    # Small shapes consistent with the module: batch=2, seq=8, in_features=32,
    # head_num=4 (in_features divisible by head_num).
    B, S, F, H = 2, 8, 32, 4

    key = jax.random.PRNGKey(0)
    kq, kk, kv, kwq, kwk, kwv, kwo = jax.random.split(key, 7)

    q = jax.random.normal(kq, (B, S, F), dtype=jnp.float32)
    k = jax.random.normal(kk, (B, S, F), dtype=jnp.float32)
    v = jax.random.normal(kv, (B, S, F), dtype=jnp.float32)

    # Deterministic parameter init mirroring the PyTorch __init__:
    #   linear_{q,k,v}.weight ~ N(0, sqrt(2/F)); linear_o.weight xavier_normal
    #   (std = sqrt(2/(F+F)) = sqrt(1/F)); LayerNorm gamma=1, beta=0.
    std_qkv = math.sqrt(2.0 / F)
    std_o = math.sqrt(1.0 / F)
    wq = std_qkv * jax.random.normal(kwq, (F, F), dtype=jnp.float32)
    wk = std_qkv * jax.random.normal(kwk, (F, F), dtype=jnp.float32)
    wv = std_qkv * jax.random.normal(kwv, (F, F), dtype=jnp.float32)
    wo = std_o * jax.random.normal(kwo, (F, F), dtype=jnp.float32)
    gamma = jnp.ones((F,), dtype=jnp.float32)
    beta = jnp.zeros((F,), dtype=jnp.float32)

    out, att_mean = multi_head_attention(q, k, v, wq, wk, wv, wo,
                                         gamma, beta, head_num=H)
    jax.block_until_ready((out, att_mean))
    assert out.shape == (B, S, F) and att_mean.shape == (S, S)
    print("KERNEL_OK")
</pallas_src>

<mosaic_0001>
module attributes {stable_mosaic.version = 11 : i64} {
  func.func @mha_kernel(%arg0: i32, %arg1: memref<1x8x32xf32, #tpu.memory_space<vmem>>, %arg2: memref<1x8x32xf32, #tpu.memory_space<vmem>>, %arg3: memref<1x8x32xf32, #tpu.memory_space<vmem>>, %arg4: memref<32x32xbf16, #tpu.memory_space<vmem>>, %arg5: memref<32x32xbf16, #tpu.memory_space<vmem>>, %arg6: memref<32x32xbf16, #tpu.memory_space<vmem>>, %arg7: memref<32x32xbf16, #tpu.memory_space<vmem>>, %arg8: memref<1x32xf32, #tpu.memory_space<vmem>>, %arg9: memref<1x32xf32, #tpu.memory_space<vmem>>, %arg10: memref<1x8x32xf32, #tpu.memory_space<vmem>>, %arg11: memref<8x8xf32, #tpu.memory_space<vmem>>, %arg12: memref<8x8xf32, #tpu.memory_space<vmem>>) attributes {dimension_semantics = [#tpu.dimension_semantics<arbitrary>], iteration_bounds = array<i64: 2>, scalar_prefetch = 0 : i64, scratch_operands = 1 : i64, tpu.core_type = #tpu.core_type<tc>, window_params = [{transform_indices = @transform_0, window_bounds = array<i64: 1, 8, 32>}, {transform_indices = @transform_1, window_bounds = array<i64: 1, 8, 32>}, {transform_indices = @transform_2, window_bounds = array<i64: 1, 8, 32>}, {pipeline_mode = #tpu.pipeline_mode<synchronous>, transform_indices = @transform_3, window_bounds = array<i64: 32, 32>}, {pipeline_mode = #tpu.pipeline_mode<synchronous>, transform_indices = @transform_4, window_bounds = array<i64: 32, 32>}, {pipeline_mode = #tpu.pipeline_mode<synchronous>, transform_indices = @transform_5, window_bounds = array<i64: 32, 32>}, {pipeline_mode = #tpu.pipeline_mode<synchronous>, transform_indices = @transform_6, window_bounds = array<i64: 32, 32>}, {pipeline_mode = #tpu.pipeline_mode<synchronous>, transform_indices = @transform_7, window_bounds = array<i64: 1, 32>}, {pipeline_mode = #tpu.pipeline_mode<synchronous>, transform_indices = @transform_8, window_bounds = array<i64: 1, 32>}, {transform_indices = @transform_9, window_bounds = array<i64: 1, 8, 32>}, {pipeline_mode = #tpu.pipeline_mode<synchronous>, transform_indices = @transform_10, window_bounds = array<i64: 8, 8>}]} {
    %c0_i32 = arith.constant 0 : i32
    %0 = arith.cmpi eq, %arg0, %c0_i32 : i32
    %1 = arith.extui %0 : i1 to i32
    %c0_i32_0 = arith.constant 0 : i32
    %2 = arith.cmpi ne, %1, %c0_i32_0 : i32
    scf.if %2 {
      %cst_43 = arith.constant 0.000000e+00 : f32
      %82 = vector.broadcast %cst_43 : f32 to vector<8x8xf32>
      %c0_44 = arith.constant 0 : index
      %c0_45 = arith.constant 0 : index
      %83 = vector.load %arg12[%c0_44, %c0_45] : memref<8x8xf32, #tpu.memory_space<vmem>>, vector<8x8xf32>
      tpu.vector_store %arg12[%c0_44, %c0_45], %82 {strides = array<i32>} : memref<8x8xf32, #tpu.memory_space<vmem>>, vector<8x8xf32>,
    } else {
    }
    %c0 = arith.constant 0 : index
    %c0_1 = arith.constant 0 : index
    %c0_2 = arith.constant 0 : index
    %3 = vector.load %arg1[%c0, %c0_1, %c0_2] : memref<1x8x32xf32, #tpu.memory_space<vmem>>, vector<1x8x32xf32>
    %4 = vector.shape_cast %3 : vector<1x8x32xf32> to vector<8x32xf32>
    %5 = arith.truncf %4 : vector<8x32xf32> to vector<8x32xbf16>
    %c0_3 = arith.constant 0 : index
    %c0_4 = arith.constant 0 : index
    %6 = vector.load %arg4[%c0_3, %c0_4] : memref<32x32xbf16, #tpu.memory_space<vmem>>, vector<32x32xbf16>
    %cst = arith.constant dense<0.000000e+00> : vector<8x32xf32>
    %7 = tpu.matmul %5, %6, %cst {dimension_numbers = #tpu.dot_dimension_numbers<[1], [0], [0], [1], [0, 0, 1, 1], [], []>} : vector<8x32xbf16>, vector<32x32xbf16>, vector<8x32xf32> -> vector<8x32xf32>
    %c0_5 = arith.constant 0 : index
    %c0_6 = arith.constant 0 : index
    %c0_7 = arith.constant 0 : index
    %8 = vector.load %arg2[%c0_5, %c0_6, %c0_7] : memref<1x8x32xf32, #tpu.memory_space<vmem>>, vector<1x8x32xf32>
    %9 = vector.shape_cast %8 : vector<1x8x32xf32> to vector<8x32xf32>
    %10 = arith.truncf %9 : vector<8x32xf32> to vector<8x32xbf16>
    %c0_8 = arith.constant 0 : index
    %c0_9 = arith.constant 0 : index
    %11 = vector.load %arg5[%c0_8, %c0_9] : memref<32x32xbf16, #tpu.memory_space<vmem>>, vector<32x32xbf16>
    %cst_10 = arith.constant dense<0.000000e+00> : vector<8x32xf32>
    %12 = tpu.matmul %10, %11, %cst_10 {dimension_numbers = #tpu.dot_dimension_numbers<[1], [0], [0], [1], [0, 0, 1, 1], [], []>} : vector<8x32xbf16>, vector<32x32xbf16>, vector<8x32xf32> -> vector<8x32xf32>
    %c0_11 = arith.constant 0 : index
    %c0_12 = arith.constant 0 : index
    %c0_13 = arith.constant 0 : index
    %13 = vector.load %arg3[%c0_11, %c0_12, %c0_13] : memref<1x8x32xf32, #tpu.memory_space<vmem>>, vector<1x8x32xf32>
    %14 = vector.shape_cast %13 : vector<1x8x32xf32> to vector<8x32xf32>
    %15 = arith.truncf %14 : vector<8x32xf32> to vector<8x32xbf16>
    %c0_14 = arith.constant 0 : index
    %c0_15 = arith.constant 0 : index
    %16 = vector.load %arg6[%c0_14, %c0_15] : memref<32x32xbf16, #tpu.memory_space<vmem>>, vector<32x32xbf16>
    %cst_16 = arith.constant dense<0.000000e+00> : vector<8x32xf32>
    %17 = tpu.matmul %15, %16, %cst_16 {dimension_numbers = #tpu.dot_dimension_numbers<[1], [0], [0], [1], [0, 0, 1, 1], [], []>} : vector<8x32xbf16>, vector<32x32xbf16>, vector<8x32xf32> -> vector<8x32xf32>
    %cst_17 = arith.constant 0.353553385 : f32
    %18 = vector.broadcast %cst_17 : f32 to vector<8x32xf32>
    %19 = arith.mulf %7, %18 : vector<8x32xf32>
    %20 = vector.shape_cast %19 : vector<8x32xf32> to vector<8x4x8xf32>
    %21 = tpu.transpose %20, [1, 0, 2] : vector<8x4x8xf32> -> vector<4x8x8xf32>
    %22 = arith.truncf %21 : vector<4x8x8xf32> to vector<4x8x8xbf16>
    %23 = vector.shape_cast %12 : vector<8x32xf32> to vector<8x4x8xf32>
    %24 = tpu.transpose %23, [1, 0, 2] : vector<8x4x8xf32> -> vector<4x8x8xf32>
    %25 = arith.truncf %24 : vector<4x8x8xf32> to vector<4x8x8xbf16>
    %26 = vector.shape_cast %17 : vector<8x32xf32> to vector<8x4x8xf32>
    %27 = tpu.transpose %26, [1, 0, 2] : vector<8x4x8xf32> -> vector<4x8x8xf32>
    %28 = arith.truncf %27 : vector<4x8x8xf32> to vector<4x8x8xbf16>
    "tpu.trace_start"() <{level = 10 : i32, message = "hsd,htd->hst"}> : () -> ()
    %cst_18 = arith.constant dense<0.000000e+00> : vector<4x8x8xf32>
    %29 = tpu.matmul %22, %25, %cst_18 {dimension_numbers = #tpu.dot_dimension_numbers<[2], [2], [1], [1], [0, 0, 0, 1, 1, 1], [0], [0]>} : vector<4x8x8xbf16>, vector<4x8x8xbf16>, vector<4x8x8xf32> -> vector<4x8x8xf32>
    "tpu.trace_stop"() : () -> ()
    %cst_19 = arith.constant dense<0xFF800000> : vector<4x8xf32>
    %30 = vector.multi_reduction <maximumf>, %29, %cst_19 [2] : vector<4x8x8xf32> to vector<4x8xf32>
    %31 = vector.shape_cast %30 : vector<4x8xf32> to vector<4x8x1xf32>
    %32 = vector.broadcast %31 : vector<4x8x1xf32> to vector<4x8x8xf32>
    %33 = arith.subf %29, %32 : vector<4x8x8xf32>
    %34 = math.exp %33 : vector<4x8x8xf32>
    %cst_20 = arith.constant dense<0.000000e+00> : vector<4x8xf32>
    %35 = vector.multi_reduction <add>, %34, %cst_20 [2] : vector<4x8x8xf32> to vector<4x8xf32>
    %36 = vector.shape_cast %35 : vector<4x8xf32> to vector<4x8x1xf32>
    %37 = tpu.reciprocal %36 {approx = true} : vector<4x8x1xf32> -> vector<4x8x1xf32>
    %38 = vector.broadcast %37 : vector<4x8x1xf32> to vector<4x8x8xf32>
    %39 = arith.mulf %34, %38 : vector<4x8x8xf32>
    %c0_21 = arith.constant 0 : index
    %c0_22 = arith.constant 0 : index
    %40 = vector.load %arg12[%c0_21, %c0_22] : memref<8x8xf32, #tpu.memory_space<vmem>>, vector<8x8xf32>
    %cst_23 = arith.constant dense<0.000000e+00> : vector<8x8xf32>
    %41 = vector.multi_reduction <add>, %39, %cst_23 [0] : vector<4x8x8xf32> to vector<8x8xf32>
    %42 = arith.addf %40, %41 : vector<8x8xf32>
    %c0_24 = arith.constant 0 : index
    %c0_25 = arith.constant 0 : index
    %43 = vector.load %arg12[%c0_24, %c0_25] : memref<8x8xf32, #tpu.memory_space<vmem>>, vector<8x8xf32>
    tpu.vector_store %arg12[%c0_24, %c0_25], %42 {strides = array<i32>} : memref<8x8xf32, #tpu.memory_space<vmem>>, vector<8x8xf32>,
    %44 = arith.truncf %39 : vector<4x8x8xf32> to vector<4x8x8xbf16>
    "tpu.trace_start"() <{level = 10 : i32, message = "hst,htd->hsd"}> : () -> ()
    %cst_26 = arith.constant dense<0.000000e+00> : vector<4x8x8xf32>
    %45 = tpu.matmul %44, %28, %cst_26 {dimension_numbers = #tpu.dot_dimension_numbers<[2], [1], [1], [2], [0, 0, 0, 1, 1, 2], [0], [0]>} : vector<4x8x8xbf16>, vector<4x8x8xbf16>, vector<4x8x8xf32> -> vector<4x8x8xf32>
    "tpu.trace_stop"() : () -> ()
    %46 = tpu.transpose %45, [1, 0, 2] : vector<4x8x8xf32> -> vector<8x4x8xf32>
    %47 = vector.shape_cast %46 : vector<8x4x8xf32> to vector<8x32xf32>
    %48 = arith.truncf %47 : vector<8x32xf32> to vector<8x32xbf16>
    %c0_27 = arith.constant 0 : index
    %c0_28 = arith.constant 0 : index
    %49 = vector.load %arg7[%c0_27, %c0_28] : memref<32x32xbf16, #tpu.memory_space<vmem>>, vector<32x32xbf16>
    %cst_29 = arith.constant dense<0.000000e+00> : vector<8x32xf32>
    %50 = tpu.matmul %48, %49, %cst_29 {dimension_numbers = #tpu.dot_dimension_numbers<[1], [0], [0], [1], [0, 0, 1, 1], [], []>} : vector<8x32xbf16>, vector<32x32xbf16>, vector<8x32xf32> -> vector<8x32xf32>
    %51 = arith.addf %50, %4 : vector<8x32xf32>
    %cst_30 = arith.constant dense<0.000000e+00> : vector<8xf32>
    %52 = vector.multi_reduction <add>, %51, %cst_30 [1] : vector<8x32xf32> to vector<8xf32>
    %53 = vector.shape_cast %52 : vector<8xf32> to vector<8x1xf32>
    %cst_31 = arith.constant 3.200000e+01 : f32
    %54 = vector.broadcast %cst_31 : f32 to vector<8x1xf32>
    %55 = arith.divf %53, %54 : vector<8x1xf32>
    %56 = vector.broadcast %55 : vector<8x1xf32> to vector<8x32xf32>
    %57 = arith.subf %51, %56 : vector<8x32xf32>
    %58 = arith.mulf %57, %57 : vector<8x32xf32>
    %cst_32 = arith.constant dense<0.000000e+00> : vector<8xf32>
    %59 = vector.multi_reduction <add>, %58, %cst_32 [1] : vector<8x32xf32> to vector<8xf32>
    %60 = vector.shape_cast %59 : vector<8xf32> to vector<8x1xf32>
    %cst_33 = arith.constant 3.200000e+01 : f32
    %61 = vector.broadcast %cst_33 : f32 to vector<8x1xf32>
    %62 = arith.divf %60, %61 : vector<8x1xf32>
    %63 = vector.broadcast %55 : vector<8x1xf32> to vector<8x32xf32>
    %64 = arith.subf %51, %63 : vector<8x32xf32>
    %cst_34 = arith.constant 9.99999974E-6 : f32
    %65 = vector.broadcast %cst_34 : f32 to vector<8x1xf32>
    %66 = arith.addf %62, %65 : vector<8x1xf32>
    %67 = math.rsqrt %66 : vector<8x1xf32>
    %68 = vector.broadcast %67 : vector<8x1xf32> to vector<8x32xf32>
    %69 = arith.mulf %64, %68 : vector<8x32xf32>
    %c0_35 = arith.constant 0 : index
    %c0_36 = arith.constant 0 : index
    %70 = vector.load %arg8[%c0_35, %c0_36] : memref<1x32xf32, #tpu.memory_space<vmem>>, vector<1x32xf32>
    %71 = vector.broadcast %70 : vector<1x32xf32> to vector<8x32xf32>
    %72 = arith.mulf %69, %71 : vector<8x32xf32>
    %c0_37 = arith.constant 0 : index
    %c0_38 = arith.constant 0 : index
    %73 = vector.load %arg9[%c0_37, %c0_38] : memref<1x32xf32, #tpu.memory_space<vmem>>, vector<1x32xf32>
    %74 = vector.broadcast %73 : vector<1x32xf32> to vector<8x32xf32>
    %75 = arith.addf %72, %74 : vector<8x32xf32>
    %c0_39 = arith.constant 0 : index
    %c0_40 = arith.constant 0 : index
    %c0_41 = arith.constant 0 : index
    %76 = vector.load %arg10[%c0_39, %c0_40, %c0_41] : memref<1x8x32xf32, #tpu.memory_space<vmem>>, vector<1x8x32xf32>
    %77 = vector.shape_cast %76 : vector<1x8x32xf32> to vector<8x32xf32>
    %78 = vector.shape_cast %75 : vector<8x32xf32> to vector<1x8x32xf32>
    tpu.vector_store %arg10[%c0_39, %c0_40, %c0_41], %78 {strides = array<i32>} : memref<1x8x32xf32, #tpu.memory_space<vmem>>, vector<1x8x32xf32>,
    %c1_i32 = arith.constant 1 : i32
    %79 = arith.cmpi eq, %arg0, %c1_i32 : i32
    %80 = arith.extui %79 : i1 to i32
    %c0_i32_42 = arith.constant 0 : i32
    %81 = arith.cmpi ne, %80, %c0_i32_42 : i32
    scf.if %81 {
      %c0_43 = arith.constant 0 : index
      %c0_44 = arith.constant 0 : index
      %82 = vector.load %arg12[%c0_43, %c0_44] : memref<8x8xf32, #tpu.memory_space<vmem>>, vector<8x8xf32>
      %cst_45 = arith.constant 1.250000e-01 : f32
      %83 = vector.broadcast %cst_45 : f32 to vector<8x8xf32>
      %84 = arith.mulf %82, %83 : vector<8x8xf32>
      %c0_46 = arith.constant 0 : index
      %c0_47 = arith.constant 0 : index
      %85 = vector.load %arg11[%c0_46, %c0_47] : memref<8x8xf32, #tpu.memory_space<vmem>>, vector<8x8xf32>
      tpu.vector_store %arg11[%c0_46, %c0_47], %84 {strides = array<i32>} : memref<8x8xf32, #tpu.memory_space<vmem>>, vector<8x8xf32>,
    } else {
    }
    return
  }
  func.func @transform_0(%arg0: i32) -> (i32, i32, i32) {
    %c0_i32 = arith.constant 0 : i32
    %c0_i32_0 = arith.constant 0 : i32
    %c0_i32_1 = arith.constant 0 : i32
    return %arg0, %c0_i32, %c0_i32_0 : i32, i32, i32
  }
  func.func @transform_1(%arg0: i32) -> (i32, i32, i32) {
    %c0_i32 = arith.constant 0 : i32
    %c0_i32_0 = arith.constant 0 : i32
    %c0_i32_1 = arith.constant 0 : i32
    return %arg0, %c0_i32, %c0_i32_0 : i32, i32, i32
  }
  func.func @transform_2(%arg0: i32) -> (i32, i32, i32) {
    %c0_i32 = arith.constant 0 : i32
    %c0_i32_0 = arith.constant 0 : i32
    %c0_i32_1 = arith.constant 0 : i32
    return %arg0, %c0_i32, %c0_i32_0 : i32, i32, i32
  }
  func.func @transform_3(%arg0: i32) -> (i32, i32) {
    %c0_i32 = arith.constant 0 : i32
    %c0_i32_0 = arith.constant 0 : i32
    %c0_i32_1 = arith.constant 0 : i32
    return %c0_i32, %c0_i32_0 : i32, i32
  }
  func.func @transform_4(%arg0: i32) -> (i32, i32) {
    %c0_i32 = arith.constant 0 : i32
    %c0_i32_0 = arith.constant 0 : i32
    %c0_i32_1 = arith.constant 0 : i32
    return %c0_i32, %c0_i32_0 : i32, i32
  }
  func.func @transform_5(%arg0: i32) -> (i32, i32) {
    %c0_i32 = arith.constant 0 : i32
    %c0_i32_0 = arith.constant 0 : i32
    %c0_i32_1 = arith.constant 0 : i32
    return %c0_i32, %c0_i32_0 : i32, i32
  }
  func.func @transform_6(%arg0: i32) -> (i32, i32) {
    %c0_i32 = arith.constant 0 : i32
    %c0_i32_0 = arith.constant 0 : i32
    %c0_i32_1 = arith.constant 0 : i32
    return %c0_i32, %c0_i32_0 : i32, i32
  }
  func.func @transform_7(%arg0: i32) -> (i32, i32) {
    %c0_i32 = arith.constant 0 : i32
    %c0_i32_0 = arith.constant 0 : i32
    %c0_i32_1 = arith.constant 0 : i32
    return %c0_i32, %c0_i32_0 : i32, i32
  }
  func.func @transform_8(%arg0: i32) -> (i32, i32) {
    %c0_i32 = arith.constant 0 : i32
    %c0_i32_0 = arith.constant 0 : i32
    %c0_i32_1 = arith.constant 0 : i32
    return %c0_i32, %c0_i32_0 : i32, i32
  }
  func.func @transform_9(%arg0: i32) -> (i32, i32, i32) {
    %c0_i32 = arith.constant 0 : i32
    %c0_i32_0 = arith.constant 0 : i32
    %c0_i32_1 = arith.constant 0 : i32
    return %arg0, %c0_i32, %c0_i32_0 : i32, i32, i32
  }
  func.func @transform_10(%arg0: i32) -> (i32, i32) {
    %c0_i32 = arith.constant 0 : i32
    %c0_i32_0 = arith.constant 0 : i32
    %c0_i32_1 = arith.constant 0 : i32
    return %c0_i32, %c0_i32_0 : i32, i32
  }
}

</mosaic_0001>

<bundles_post_ra>
// kernel: tpu_custom_call.1
= control target key start
LH: loop header
LB: loop body
LE: loop exit
PB: predicated region body
PF: predicated region fallthrough
CT: control target
= control target key end

     0   :  { %s2725_s0 = inlined_call_operand.hbm [shape: f32[2,8,32], index: 0, kind: input, shape index: {}]   ;;  %s2726_s1 = inlined_call_operand.hbm [shape: f32[2,8,32], index: 1, kind: input, shape index: {}]   ;;  %s2727_s2 = inlined_call_operand.hbm [shape: f32[2,8,32], index: 2, kind: input, shape index: {}]   ;;  %s2728_s3 = inlined_call_operand.hbm [shape: bf16[32,32], index: 3, kind: input, shape index: {}]   ;;  %s2729_s4 = inlined_call_operand.hbm [shape: bf16[32,32], index: 4, kind: input, shape index: {}]   ;;  %s2730_s5 = inlined_call_operand.hbm [shape: bf16[32,32], index: 5, kind: input, shape index: {}]   ;;  %s2731_s6 = inlined_call_operand.hbm [shape: bf16[32,32], index: 6, kind: input, shape index: {}]   ;;  %s2732_s7 = inlined_call_operand.vmem [shape: f32[1,32], index: 7, kind: input, shape index: {}]   ;;  %s2733_s8 = inlined_call_operand.vmem [shape: f32[1,32], index: 8, kind: input, shape index: {}]   ;;  %s2734_s9 = inlined_call_operand.hbm [shape: f32[2,8,32], index: 9, kind: output, shape index: {0}]   ;;  %s2735_s10 = inlined_call_operand.hbm [shape: f32[8,8], index: 10, kind: output, shape index: {1}]  }
   0x1   :  { %2748 = sst [smem:[#allocation29_spill]] %s2726_s1 }
   0x2   :  { %2749 = sst [smem:[#allocation30_spill]] %s2728_s3 }
   0x3   :  { %2750 = sst [smem:[#allocation31_spill]] %s2729_s4 }
   0x4   :  { %2751 = sst [smem:[#allocation32_spill]] %s2730_s5 }
   0x5   :  { %2752 = sst [smem:[#allocation33_spill]] %s2731_s6 }
   0x6   :  { %16 = vsyncpa [#allocation4], 0 }
   0x7   :  { %18 = vsyncpa [#allocation4 + $0x1], 0 }
   0x8   :  { %19 = vsyncpa [#allocation7], 0 }
   0x9   :  { %21 = vsyncpa [#allocation7 + $0x1], 0 }
   0xa   :  { %22 = vsyncpa [#allocation10], 0 }
   0xb   :  { %23 = vsyncpa [#allocation13], 0 }
   0xc   :  { %24 = vsyncpa [#allocation5], 0 }
   0xd   :  { %26 = vsyncpa [#allocation5 + $0x1], 0 }
   0xe   :  { %27 = vsyncpa [#allocation17], 0  ;;  %s2225_s13 = smov 0   ;;  %s2227_s14 = smov 0  }
   0xf   :  { %s2229_s15 = smov 0   ;;  %s2231_s16 = smov 0  }
  0x10 LB: > { %2753 = sst [smem:[#allocation24_spill]] %s2139_s13  ;;  %s2249_s20 = sadd.s32 4294967295, %s2151_s16   ;;  %s2151_s16 = sphi %s2231_s16, %s2784_s16   ;;  %s2147_s15 = sphi %s2229_s15, %s2788_s15   ;;  %s2143_s14 = sphi %s2227_s14, %s2787_s14   ;;  %s2139_s13 = sphi %s2225_s13, %s2786_s13  }
  0x11   : > { %2754 = sst [smem:[#allocation25_spill]] %s2151_s16  ;;  %p1612_p0 = scmp.ge.s32.totalorder %s2151_s16, 1 }
  0x12   : > { %s2755_s3 = sld [smem:[#allocation30_spill]]  ;;  %p2746_p1 = scmp.eq.s32.totalorder %s2249_s20, 0 }
  0x13   : > { %p289_p2 = scmp.lt.s32.totalorder %s2151_s16, 3  ;;  %s2153_s22 = smov [#allocation9]  }
  0x14   : > { %s302_s23 = sshll.u32 %s2153_s22, 4  ;;  %s2757_s5 = sld [smem:[#allocation32_spill]]  ;;  %s303_s23 = int_to_ptr.vmem [resolvable:$true] %s302_s23 }
  0x15   : > { %p2255_p4 = pnand %p1612_p0, %p289_p2  ;;  %s2154_s28 = smov [#allocation12]  }
  0x16   : > { %s330_s29 = sshll.u32 %s2154_s28, 4  ;;  %s2736_s30 = smov 64   ;;  %s331_s29 = int_to_ptr.vmem [resolvable:$true] %s330_s29 }
  0x17   : > { %p1721_p5 = pneg %p2255_p4  ;;  %s2738_s11 = smov 4  }
  0x18   : > { %s300_s19 = sshll.u32 %s2755_s3, 4  ;;  %s1611_s12 = sadd.s32 4294967294, %s2151_s16   ;;  %s301_s19 = int_to_ptr.hbm [resolvable:$true] %s300_s19 }
  0x19   : > { %p2267_p7 = pnand %p1721_p5, %p2746_p1  ;;  %s2283_s17 = sadd.s32 1, %s2151_s16  }
  0x1a   : > { %s328_s26 = sshll.u32 %s2757_s5, 4  ;;  %2759 = sst [smem:[#allocation26_spill]] %s2283_s17  ;;  %s329_s26 = int_to_ptr.hbm [resolvable:$true] %s328_s26 }
  0x1b   : > { %1724 = dma.hbm_to_vmem [thread:$0]  (!%p2267_p7), %s301_s19, 256, %s303_s23, [#allocation10], %s2736_s30, %s2736_s30, %s2738_s11  }
  0x1c   : > { %1730 = dma.hbm_to_vmem [thread:$0]  (!%p2267_p7), %s329_s26, 256, %s331_s29, [#allocation13], %s2736_s30, %s2736_s30, %s2738_s11  }
  0x1d   : > { %s37_s18 = ssub.s32 %s2151_s16, %s2283_s17  ;;  %s40_s22 = sadd.s32 1, %s2147_s15 }
  0x1e   : > { %p38_p8 = scmp.eq.s32.totalorder %s37_s18, 0  ;;  %p47_p9 = scmp.ne.s32.totalorder %s2147_s15, %s2143_s14 }
  0x1f   : > { %p48_p10 = scmp.eq.s32.totalorder %s2151_s16, 0  ;;  %p53_p11 = scmp.ne.s32.totalorder %s2143_s14, %s2139_s13 }
  0x20   : > { %s2294_s19 = scalar_select %p38_p8, %s2147_s15, %s40_s22  }
  0x21   : > { %p49_p12 = por %p48_p10, %p47_p9  ;;  %p2298_p13 = por %p2746_p1, %p53_p11 }
  0x22   : > { %2760 = sst [smem:[#allocation27_spill]] %s2294_s19  ;;  %p2745_p0 = scmp.eq.s32.totalorder %s2249_s20, 1 }
  0x23   : > { %p261_p2 = scmp.eq.s32.totalorder %s1611_s12, 1  ;;  %p1752_p5 = scmp.lt.s32.totalorder %s2151_s16, 2 }
  0x24   : > { %s2740_s24 = sand.u32 1, %s2147_s15   ;;  %p2307_p6 = por %p2745_p0, %p47_p9 }
  0x25   : > { %p2311_p3 = por %p261_p2, %p53_p11  ;;  %s2317_s28 = sshll.u32 %s2740_s24, 3 }
  0x26   : > { %s2320_s29 = sshll.u32 %s2151_s16, 3  ;;  %p2322_p8 = pnand %p1752_p5, %p49_p12 }
  0x27   : > { %s2763_s26 = scalar_select %p2311_p3, 1, 0 }
  0x28   : > { %s383_s18 = sand.u32 1, %s2151_s16   ;;  %s2766_s1 = sld [smem:[#allocation29_spill]] }
  0x29   : > { %2764 = sst [smem:[#allocation28_spill]] %s2763_s26  ;;  %s387_s5 = scalar_lea.vmem [#allocation6], %s2317_s28 }
  0x2a   : > { %s395_s19 = sshll.u32 %s387_s5, 4  ;;  %s2332_s24 = scalar_lea.sflag [#allocation7], %s383_s18  ;;  %s396_s19 = int_to_ptr.vmem [resolvable:$true] %s395_s19 }
  0x2b   : > { %p1895_p10 = pneg %p2322_p8 }
  0x2e   : > { %s391_s11 = scalar_lea.hbm %s2766_s1, %s2320_s29 }
  0x2f   : > { %s393_s3 = sshll.u32 %s391_s11, 4  ;;  %s1898_s11 = scalar_lea.hbm %s2766_s1, 16  ;;  %s394_s3 = int_to_ptr.hbm [resolvable:$true] %s393_s3 }
  0x30   : > { %s1891_s17 = sshra.s32 %s394_s3, 4  ;;  %s1892_s17 = int_to_ptr.hbm [resolvable:$true] %s1891_s17 }
  0x31   : > { %s1893_s26 = scalar_lea.hbm %s1892_s17, 8  ;;  %p1899_p2 = scmp.lt.s32.totalorder %s1892_s17, %s2766_s1 }
  0x32   : > { %p1894_p9 = scmp.ne.s32.totalorder %s1892_s17, %s1893_s26  ;;  %p1900_p5 = scmp.lt.s32.totalorder %s1898_s11, %s1893_s26 }
  0x34   : > { %p1896_p11 = pnand %p1895_p10, %p1894_p9  ;;  %p1901_p0 = por %p1900_p5, %p1899_p2 }
  0x36   : > { %p1897_p12 = pneg %p1896_p11 }
  0x38   : > { %p1902_p1 = pnand %p1901_p0, %p1897_p12 }
  0x3a   : > { %1905 = shalt.err (!%p1902_p1)
}
  0x3b   : > { %1740 = dma.hbm_to_vmem [thread:$0]  (!%p2322_p8), %s394_s3, 128, %s396_s19, %s2332_s24  }
  0x3c   : > { %s2767_s4 = sld [smem:[#allocation31_spill]]  ;;  %s2157_s30 = smov [#allocation11]  }
  0x3d   : > { %s316_s17 = sshll.u32 %s2157_s30, 4  ;;  %s2768_s6 = sld [smem:[#allocation33_spill]]  ;;  %s317_s17 = int_to_ptr.vmem [resolvable:$true] %s316_s17 }
  0x3e   : > { %s2769_s5 = smov 4   ;;  %s2770_s1 = smov 64  }
  0x3f   : > { %s2158_s3 = smov [#allocation14]   ;;  %s372_s30 = scalar_lea.hbm %s2725_s0, %s2320_s29 }
  0x40   : > { %s344_s19 = sshll.u32 %s2158_s3, 4  ;;  %s368_s26 = scalar_lea.vmem [#allocation3], %s2317_s28  ;;  %s345_s19 = int_to_ptr.vmem [resolvable:$true] %s344_s19 }
  0x41   : > { %s376_s11 = sshll.u32 %s368_s26, 4  ;;  %s377_s11 = int_to_ptr.vmem [resolvable:$true] %s376_s11 }
  0x42   : > { %s314_s16 = sshll.u32 %s2767_s4, 4  ;;  %s374_s4 = sshll.u32 %s372_s30, 4  ;;  %s315_s16 = int_to_ptr.hbm [resolvable:$true] %s314_s16  ;;  %s375_s4 = int_to_ptr.hbm [resolvable:$true] %s374_s4 }
  0x43   : > { %s342_s22 = sshll.u32 %s2768_s6, 4  ;;  %s1981_s6 = sshra.s32 %s375_s4, 4  ;;  %s343_s22 = int_to_ptr.hbm [resolvable:$true] %s342_s22  ;;  %s1982_s6 = int_to_ptr.hbm [resolvable:$true] %s1981_s6 }
  0x44   : > { %1727 = dma.hbm_to_vmem [thread:$0]  (!%p2267_p7), %s315_s16, 256, %s317_s17, [#allocation10], %s2770_s1, %s2770_s1, %s2769_s5  }
  0x45   : > { %1733 = dma.hbm_to_vmem [thread:$0]  (!%p2267_p7), %s343_s22, 256, %s345_s19, [#allocation13], %s2770_s1, %s2770_s1, %s2769_s5  }
  0x46   : > { %s2771_s16 = sand.u32 1, %s2147_s15   ;;  %s1983_s3 = scalar_lea.hbm %s1982_s6, 8 }
  0x47   : > { %s365_s17 = scalar_lea.sflag [#allocation4], %s2771_s16  ;;  %p1984_p1 = scmp.ne.s32.totalorder %s1982_s6, %s1983_s3 }
  0x48   : > { %s1988_s22 = scalar_lea.hbm %s2725_s0, 16  ;;  %p1989_p7 = scmp.lt.s32.totalorder %s1982_s6, %s2725_s0 }
  0x49   : > { %p1986_p0 = pnand %p1984_p1, %p1895_p10  ;;  %p1990_p11 = scmp.lt.s32.totalorder %s1988_s22, %s1983_s3 }
  0x4b   : > { %p1987_p9 = pneg %p1986_p0  ;;  %p1991_p12 = por %p1990_p11, %p1989_p7 }
  0x4d   : > { %p1992_p2 = pnand %p1991_p12, %p1987_p9 }
  0x4f   : > { %1995 = shalt.err (!%p1992_p2)
}
  0x50   : > { %1737 = dma.hbm_to_vmem [thread:$0]  (!%p2322_p8), %s375_s4, 128, %s377_s11, %s365_s17  }
  0x51   : > { %s410_s30 = scalar_lea.hbm %s2727_s2, %s2320_s29  ;;  %s406_s26 = scalar_lea.vmem [#allocation8], %s2317_s28 }
  0x52   : > { %s414_s16 = sshll.u32 %s406_s26, 4  ;;  %s412_s1 = sshll.u32 %s410_s30, 4  ;;  %s415_s16 = int_to_ptr.vmem [resolvable:$true] %s414_s16  ;;  %s413_s1 = int_to_ptr.hbm [resolvable:$true] %s412_s1 }
  0x53   : > { %s2011_s6 = sshra.s32 %s413_s1, 4  ;;  %s2018_s4 = scalar_lea.hbm %s2727_s2, 16  ;;  %s2012_s6 = int_to_ptr.hbm [resolvable:$true] %s2011_s6 }
  0x54   : > { %s2013_s3 = scalar_lea.hbm %s2012_s6, 8  ;;  %p2019_p9 = scmp.lt.s32.totalorder %s2012_s6, %s2727_s2 }
  0x55   : > { %p2014_p5 = scmp.ne.s32.totalorder %s2012_s6, %s2013_s3  ;;  %p2020_p7 = scmp.lt.s32.totalorder %s2018_s4, %s2013_s3 }
  0x57   : > { %p2016_p1 = pnand %p2014_p5, %p1895_p10  ;;  %p2021_p11 = por %p2020_p7, %p2019_p9 }
  0x59   : > { %p2017_p0 = pneg %p2016_p1 }
  0x5b   : > { %p2022_p12 = pnand %p2021_p11, %p2017_p0 }
  0x5d   : > { %2025 = shalt.err (!%p2022_p12)
}
  0x5e   : > { %1743 = dma.hbm_to_vmem [thread:$0]  (!%p2322_p8), %s413_s1, 128, %s415_s16, %s2332_s24  }
  0x5f   : > { %423 = sbr.rel (%p2255_p4) target bundleno = 1507 (0x5e3), region = 56  ;;  %s2402_s28 = sand.u32 (!%p2255_p4), 1, %s2143_s14  }
  0x60   : > { %s2405_s29 = sshll.u32 (!%p2255_p4), %s2402_s28, 3  ;;  %s426_s5 = scalar_lea.sflag (!%p2255_p4), [#allocation4], %s2402_s28 }
  0x61   : > { %s429_s19 = scalar_lea.vmem (!%p2255_p4), [#allocation3], %s2405_s29 }
  0x64   : > { %2114 = dma.done.wait (%p2298_p13), %s426_s5, 128  }
  0x65   : > { %2116 = vsyncadd (%p2298_p13), %s426_s5, 4294967168  ;;  %s435_s21 = sand.u32 1, %s2249_s20   ;;  %s439_s12 = scalar_lea.vmem [#allocation6], %s2405_s29 }
  0x66   : > { %s436_s24 = scalar_lea.sflag [#allocation7], %s435_s21 }
  0x67   : > { %2118 = dma.done.wait (%p2298_p13), %s436_s24, 256  }
  0x68   : > { %2120 = vsyncadd (%p2298_p13), %s436_s24, 4294967040  ;;  %s449_s13 = scalar_lea.vmem [#allocation8], %s2405_s29  ;;  %p2772_p4 = scmp.eq.s32.totalorder %s2249_s20, 0 }
  0x6a   : > { %2122 = dma.done.wait (%p2772_p4), [#allocation10], 512   ;;  %p2773_p8 = pmov %p2772_p4 }
  0x6b   : > { %p2774_p10 = pmov %p2772_p4 }
  0x6c   : > { %2124 = vsyncadd (%p2773_p8), [#allocation10], 4294966784 }
  0x6d   : > { %2126 = dma.done.wait (%p2774_p10), [#allocation13], 512   ;;  %p2775_p2 = pmov %p2772_p4 }
  0x6e   : > { %s514_s18 = scalar_lea.vmem [#allocation15], %s2405_s29  ;;  %p2776_p5 = scmp.ne.s32.totalorder %s2249_s20, 0 }
  0x6f   : > { %2128 = vsyncadd (%p2775_p2), [#allocation13], 4294966784 }
  0x70   : > { %521 = sbr.rel (%p2776_p5) target bundleno = 119 (0x77), region = 88 }
  0x75   : > { %vm522_vm0 = vcmask 64512   ;;  %v2159_v0 = vmov 0.0  }
  0x76   : > { %523 = vst.msk [vmem:[#allocation2] sm:$0xff] %vm522_vm0, %v2159_v0 }
  0x77 PF: > { %v1686_v1 = vld [vmem:[#allocation9 + $0x8] sm:$0xff]  ;;  %v1688_v2 = vld [vmem:[#allocation11 + $0x8] sm:$0xff]  ;;  %v1685_v3 = vld [vmem:[#allocation9] sm:$0xff]  ;;  %vm542_vm1 = vcmask 261120   ;;  %s2160_s23 = smov 104   ;;  %s2161_s30 = smov 120  }
  0x78   : > { %v1687_v4 = vld [vmem:[#allocation11] sm:$0xff]  ;;  %552 = vmatpush.bf16.msra.mxu0 %v1686_v1  ;;  %586 = vmatpush.bf16.msra.mxu1 %v1688_v2  ;;  %v559_v6 = vld [vmem:[%s439_s12] sm:$0xff]  ;;  %s2162_s26 = smov 112   ;;  %v2163_v19 = vmov 1983009808   ;;  %vm639_vm2 = vcmask 1047556  }
  0x79   : > { %v2431_v5 = vld [vmem:[%s429_s19] sm:$0xff]  ;;  %v560_v8 = vpack.c.bf16 %v559_v6, %v559_v6  ;;  %v1690_v14 = vld [vmem:[#allocation12 + $0x8] sm:$0xff]  ;;  %v1689_v15 = vld [vmem:[#allocation12] sm:$0xff]  ;;  %v644_v20 = vunpack.c.l.s4 %v2163_v19  ;;  %v2164_v32 = vmov 1934713408   ;;  %vm1001_vm3 = vcmask 64512  }
  0x7a   : > { %v525_v7 = vpack.c.bf16 %v2431_v5, %v2431_v5  ;;  %620 = vmatpush.bf16.msra.mxu2 %v1690_v14  ;;  %v593_v16 = vld [vmem:[%s449_s13] sm:$0xff]  ;;  %v668_v33 = vunpack.c.l.s4 %v2164_v32  ;;  %vm1139_vm4 = vcmask 1043456   ;;  %s2165_s16 = smov 24   ;;  %s2166_s1 = smov 16   ;;  %vm1336_vm5 = vcmask 130048  }
  0x7b   : > { %v594_v17 = vpack.c.bf16 %v593_v16, %v593_v16  ;;  %v2447_v28 = vunpack.c.0.s8 %v644_v20  ;;  %s2167_s6 = smov 8   ;;  %vm1338_vm6 = vcmask 195584   ;;  %p1678_p13 = scmp.ne.s32.totalorder %s2249_s20, 1 }
  0x7c   : > { %553 = vmatpush.bf16.msra.mxu0 %v1685_v3  ;;  %587 = vmatpush.bf16.msra.mxu1 %v1687_v4  ;;  %v2456_v41 = vunpack.c.0.s8 %v668_v33 }
  0x7e   : > { %621 = vmatpush.bf16.msra.mxu2 %v1689_v15 }
  0x7f   : > { %1642 = vmatmul.msk.bf16.vlgmr.msra.gmra.mxu0 %vm542_vm1, %v525_v7  ;;  %1651 = vmatmul.msk.bf16.vlgmr.msra.gmra.mxu1 %vm542_vm1, %v560_v8 }
  0x81   : > { %1660 = vmatmul.msk.bf16.vlgmr.msra.gmra.mxu2 %vm542_vm1, %v594_v17 }
  0xfc   : > { %v555_v9 = vpop.f32.mrf.mxu0  ;;  %v589_v10 = vpop.f32.mrf.mxu1 }
  0xfd   : > { %v627_v11 = vmul.f32 0.35355338, %v555_v9  ;;  %760 = vrot.lane.b32.xlu1 %v589_v10, %s2160_s23  ;;  %754 = vrot.lane.b32.xlu0 %v589_v10, %s2161_s30  ;;  %v765_v39 = vrot.slane %v589_v10, 4 }
  0xff   : > { %632 = vrot.lane.b32.xlu2 %v627_v11, %s2162_s26  ;;  %v641_v26 = vrot.slane %v627_v11, 4 }
 0x104   : > { %v591_v12 = vpop.f32.mrf.mxu1  ;;  %v557_v13 = vpop.f32.mrf.mxu0 }
 0x105   : > { %757 = vrot.lane.b32.xlu0 %v589_v10, %s2162_s26  ;;  %629 = vrot.lane.b32.xlu1 %v627_v11, %s2161_s30 }
 0x107   : > { %635 = vrot.lane.b32.xlu2 %v627_v11, %s2160_s23 }
 0x159   : > { %v633_v18 = vpop.permute.xlu2 %632 }
 0x15a   : > { %v638_v21 = vrot.slane %v633_v18, 4  ;;  %v642_v34 = vsel %vm639_vm2, %v633_v18, %v641_v26 }
 0x15b   : > { %v650_v40 = vperm.slane %v642_v34, %v2447_v28 }
 0x15c   : > { %v640_v29 = vsel %vm639_vm2, %v638_v21, %v627_v11 }
 0x15d   : > { %v646_v36 = vperm.slane %v640_v29, %v2447_v28  ;;  %v677_v59 = vrot.slane %v650_v40, 4 }
 0x15f   : > { %v665_v51 = vrot.slane %v646_v36, 4 }
 0x161   : > { %v636_v31 = vpop.permute.xlu2 %635 }
 0x162   : > { %v651_v38 = vrot.slane %v636_v31, 4 }
 0x16f   : > { %v761_v22 = vpop.permute.xlu1 %760  ;;  %v755_v23 = vpop.permute.xlu0 %754 }
 0x170   : > { %v775_v24 = vrot.slane %v761_v22, 4  ;;  %v777_v25 = vrot.slane %v755_v23, 4 }
 0x172   : > { %v778_v27 = vsel %vm639_vm2, %v761_v22, %v777_v25  ;;  %v776_v30 = vsel %vm639_vm2, %v775_v24, %v755_v23 }
 0x173   : > { %v786_v35 = vperm.slane %v778_v27, %v2447_v28  ;;  %v782_v37 = vperm.slane %v776_v30, %v2447_v28 }
 0x175   : > { %v799_v48 = vrot.slane %v786_v35, 4  ;;  %v787_v52 = vrot.slane %v782_v37, 4 }
 0x177   : > { %v758_v42 = vpop.permute.xlu0 %757  ;;  %v630_v43 = vpop.permute.xlu1 %629 }
 0x178   : > { %v763_v44 = vrot.slane %v758_v42, 4  ;;  %v766_v45 = vsel %vm639_vm2, %v758_v42, %v765_v39  ;;  %v652_v46 = vsel %vm639_vm2, %v651_v38, %v630_v43  ;;  %v653_v47 = vrot.slane %v630_v43, 4 }
 0x179   : > { %v774_v49 = vperm.slane %v766_v45, %v2447_v28  ;;  %v658_v50 = vperm.slane %v652_v46, %v2447_v28 }
 0x17a   : > { %v764_v53 = vsel %vm639_vm2, %v763_v44, %v589_v10  ;;  %v654_v54 = vsel %vm639_vm2, %v636_v31, %v653_v47 }
 0x17b   : > { %v770_v55 = vperm.slane %v764_v53, %v2447_v28  ;;  %v800_v56 = vsel %vm639_vm2, %v799_v48, %v774_v49  ;;  %v801_v57 = vrot.slane %v774_v49, 4  ;;  %v662_v58 = vperm.slane %v654_v54, %v2447_v28 }
 0x17c   : > { %v806_v60 = vperm.slane %v800_v56, %v2456_v41  ;;  %v663_v61 = vrot.slane %v658_v50, 4  ;;  %v666_v62 = vsel %vm639_vm2, %v658_v50, %v665_v51 }
 0x17d   : > { %v788_v63 = vsel %vm639_vm2, %v787_v52, %v770_v55  ;;  %v789_v0 = vrot.slane %v770_v55, 4  ;;  %v802_v1 = vsel %vm639_vm2, %v786_v35, %v801_v57  ;;  %v674_v2 = vperm.slane %v666_v62, %v2456_v41 }
 0x17e   : > { %v794_v3 = vperm.slane %v788_v63, %v2456_v41  ;;  %v810_v4 = vperm.slane %v802_v1, %v2456_v41  ;;  %v815_v6 = vrot.slane %v806_v60, 4  ;;  %v664_v7 = vsel %vm639_vm2, %v663_v61, %v646_v36 }
 0x17f   : > { %v790_v8 = vsel %vm639_vm2, %v782_v37, %v789_v0  ;;  %v670_v9 = vperm.slane %v664_v7, %v2456_v41  ;;  %v675_v10 = vrot.slane %v662_v58, 4  ;;  %v678_v11 = vsel %vm639_vm2, %v662_v58, %v677_v59 }
 0x180   : > { %v798_v12 = vperm.slane %v790_v8, %v2456_v41  ;;  %v811_v13 = vrot.slane %v794_v3, 4  ;;  %v816_v14 = vsel %vm639_vm2, 0.0, %v815_v6  ;;  %v817_v15 = vrot.slane %v810_v4, 4 }
 0x181   : > { %v676_v16 = vsel %vm639_vm2, %v675_v10, %v650_v40  ;;  %v686_v17 = vperm.slane %v678_v11, %v2456_v41  ;;  %v687_v18 = vrot.slane %v670_v9, 4  ;;  %v689_v19 = vrot.slane %v674_v2, 4 }
 0x182   : > { %v813_v20 = vrot.slane %v798_v12, 4  ;;  %v818_v21 = vsel %vm639_vm2, 0.0, %v817_v15  ;;  %v830_v22 = vsel %vm639_vm2, %v817_v15, %v806_v60  ;;  %v682_v23 = vperm.slane %v676_v16, %v2456_v41 }
 0x183   : > { %v834_v24 = vperm.slane %v830_v22, %v2447_v28  ;;  %v835_v25 = vrot.slane %v818_v21, 4  ;;  %v688_v26 = vsel %vm639_vm2, 0.0, %v687_v18  ;;  %v690_v27 = vsel %vm639_vm2, 0.0, %v689_v19 }
 0x184   : > { %v814_v29 = vsel %vm639_vm2, 0.0, %v813_v20  ;;  %v691_v30 = vrot.slane %v682_v23, 4  ;;  %v693_v31 = vrot.slane %v686_v17, 4  ;;  %v695_v32 = vsel %vm639_vm2, %v689_v19, %v670_v9 }
 0x185   : > { %v824_v33 = vrot.slane %v814_v29, 4  ;;  %v836_v34 = vsel %vm639_vm2, %v835_v25, %v816_v14  ;;  %v699_v35 = vperm.slane %v695_v32, %v2447_v28  ;;  %v700_v36 = vrot.slane %v690_v27, 4 }
 0x186   : > { %v692_v37 = vsel %vm639_vm2, 0.0, %v691_v30  ;;  %v694_v38 = vsel %vm639_vm2, 0.0, %v693_v31  ;;  %v706_v39 = vsel %vm639_vm2, %v693_v31, %v682_v23  ;;  %v812_v40 = vsel %vm639_vm2, 0.0, %v811_v13 }
 0x187   : > { %v701_v42 = vsel %vm639_vm2, %v700_v36, %v688_v26  ;;  %v710_v43 = vperm.slane %v706_v39, %v2447_v28  ;;  %v711_v44 = vrot.slane %v694_v38, 4  ;;  %v719_v45 = vrot.slane %v699_v35, 4 }
 0x188   : > { %v705_v46 = vperm.slane %v701_v42, %v2447_v28  ;;  %v819_v47 = vsel %vm639_vm2, %v813_v20, %v794_v3  ;;  %v825_v48 = vsel %vm639_vm2, %v824_v33, %v812_v40  ;;  %v840_v49 = vperm.slane %v836_v34, %v2447_v28 }
 0x189   : > { %v712_v50 = vsel %vm639_vm2, %v711_v44, %v692_v37  ;;  %v823_v51 = vperm.slane %v819_v47, %v2447_v28  ;;  %v829_v52 = vperm.slane %v825_v48, %v2447_v28  ;;  %v855_v53 = vrot.slane %v834_v24, 4  ;;  %v2538_v44 = vpop.f32.mrf.mxu2 }
 0x18a   : > { %v853_v54 = vrot.slane %v840_v49, 4  ;;  %v716_v55 = vperm.slane %v712_v50, %v2447_v28  ;;  %v731_v56 = vrot.slane %v710_v43, 4  ;;  %v720_v60 = vsel %vm639_vm2, %v705_v46, %v719_v45 }
 0x18b   : > { %v843_v57 = vrot.slane %v823_v51, 4  ;;  %v856_v58 = vsel %vm639_vm2, %v840_v49, %v855_v53  ;;  %v841_v59 = vrot.slane %v829_v52, 4  ;;  %v717_v0 = vrot.slane %v705_v46, 4 }
 0x18c   : > { %v864_v61 = vperm.slane %v856_v58, %v2456_v41  ;;  %v854_v62 = vsel %vm639_vm2, %v853_v54, %v834_v24  ;;  %v732_v63 = vsel %vm639_vm2, %v716_v55, %v731_v56  ;;  %v728_v11 = vperm.slane %v720_v60, %v2456_v41 }
 0x18d   : > { %v844_v1 = vsel %vm639_vm2, %v829_v52, %v843_v57  ;;  %v842_v2 = vsel %vm639_vm2, %v841_v59, %v823_v51  ;;  %v860_v3 = vperm.slane %v854_v62, %v2456_v41  ;;  %v740_v4 = vperm.slane %v732_v63, %v2456_v41 }
 0x18e   : > { %v852_v6 = vperm.slane %v844_v1, %v2456_v41  ;;  %v869_v7 = vrot.slane %v864_v61, 4  ;;  %v848_v8 = vperm.slane %v842_v2, %v2456_v41  ;;  %v718_v9 = vsel %vm639_vm2, %v717_v0, %v699_v35 }
 0x18f   : > { %v865_v10 = vrot.slane %v860_v3, 4  ;;  %v729_v12 = vrot.slane %v716_v55, 4  ;;  %v724_v16 = vperm.slane %v718_v9, %v2456_v41  ;;  %v745_v23 = vrot.slane %v740_v4, 4 }
 0x190   : > { %v870_v13 = vsel %vm639_vm2, %v869_v7, %v852_v6  ;;  %v871_v14 = vrot.slane %v852_v6, 4  ;;  %v867_v15 = vrot.slane %v848_v8, 4  ;;  %v747_v31 = vrot.slane %v728_v11, 4 }
 0x191   : > { %v875_v17 = vpack.c.bf16 %v870_v13, %v870_v13  ;;  %v866_v18 = vsel %vm639_vm2, %v865_v10, %v848_v8  ;;  %v730_v19 = vsel %vm639_vm2, %v729_v12, %v710_v43  ;;  %v743_v30 = vrot.slane %v724_v16, 4  ;;  %v625_v45 = vpop.f32.mrf.mxu2 }
 0x192   : > { %v873_v20 = vpack.c.bf16 %v866_v18, %v866_v18  ;;  %v872_v21 = vsel %vm639_vm2, %v864_v61, %v871_v14  ;;  %v868_v22 = vsel %vm639_vm2, %v860_v3, %v867_v15  ;;  %v736_v27 = vperm.slane %v730_v19, %v2456_v41 }
 0x193   : > { %v1044_v24 = vsel %vm1001_vm3, %v875_v17, 0  ;;  %v876_v25 = vpack.c.bf16 %v872_v21, %v872_v21  ;;  %v874_v26 = vpack.c.bf16 %v868_v22, %v868_v22  ;;  %v746_v35 = vsel %vm639_vm2, %v745_v23, %v728_v11 }
 0x194   : > { %1053 = vmatpush.bf16.xpose.msrb.mxu1 %v1044_v24  ;;  %v1006_v29 = vsel %vm1001_vm3, %v873_v20, 0  ;;  %v741_v34 = vrot.slane %v736_v27, 4  ;;  %v748_v37 = vsel %vm639_vm2, %v740_v4, %v747_v31  ;;  %v744_v38 = vsel %vm639_vm2, %v736_v27, %v743_v30 }
 0x195   : > { %1015 = vmatpush.bf16.xpose.msra.mxu3 %v1006_v29  ;;  %v1063_v32 = vsel %vm1001_vm3, %v876_v25, 0  ;;  %v1025_v33 = vsel %vm1001_vm3, %v874_v26, 0  ;;  %v751_v39 = vpack.c.bf16 %v746_v35, %v746_v35  ;;  %v752_v42 = vpack.c.bf16 %v748_v37, %v748_v37 }
 0x196   : > { %1072 = vmatpush.bf16.xpose.msrb.mxu2 %v1063_v32  ;;  %1034 = vmatpush.bf16.xpose.msrb.mxu0 %v1025_v33  ;;  %v742_v36 = vsel %vm639_vm2, %v741_v34, %v724_v16  ;;  %v750_v43 = vpack.c.bf16 %v744_v38, %v744_v38  ;;  %v889_v22 = vrot.slane %v2538_v44, 4 }
 0x197   : > { %v749_v40 = vpack.c.bf16 %v742_v36, %v742_v36 }
 0x19b   : > { %1663 = vmatmul.msk.bf16.vlgmr.msrb.gmra.mxu1 %vm1001_vm3, %v751_v39 }
 0x19c   : > { %1661 = vmatmul.msk.bf16.vlgmr.msra.gmra.mxu3 %vm1001_vm3, %v749_v40 }
 0x19d   : > { %1664 = vmatmul.msk.bf16.vlgmr.msrb.gmra.mxu2 %vm1001_vm3, %v752_v42  ;;  %1662 = vmatmul.msk.bf16.vlgmr.msrb.gmra.mxu0 %vm1001_vm3, %v750_v43 }
 0x218   : > { %v1055_v46 = vpop.f32.mrf.mxu1 }
 0x219   : > { %v1084_v47 = vsel %vm1001_vm3, %v1055_v46, -inf }
 0x21a   : > { %1085 = vmax.xlane.f32.xlu2 %v1084_v47  ;;  %v1036_v48 = vpop.f32.mrf.mxu0 }
 0x21b   : > { %v1081_v54 = vsel %vm1001_vm3, %v1036_v48, -inf }
 0x21f   : > { %v1017_v49 = vpop.f32.mrf.mxu3 }
 0x220   : > { %v1057_v50 = vpop.f32.mrf.mxu1  ;;  %v1074_v51 = vpop.f32.mrf.mxu2  ;;  %v1078_v52 = vsel %vm1001_vm3, %v1017_v49, -inf }
 0x221   : > { %v1087_v53 = vsel %vm1001_vm3, %v1074_v51, -inf  ;;  %1079 = vmax.xlane.f32.xlu0 %v1078_v52 }
 0x222   : > { %1088 = vmax.xlane.f32.xlu1 %v1087_v53  ;;  %1082 = vmax.xlane.f32.xlu2 %v1081_v54  ;;  %v1038_v55 = vpop.f32.mrf.mxu0 }
 0x227   : > { %v1019_v56 = vpop.f32.mrf.mxu3 }
 0x228   : > { %v1076_v57 = vpop.f32.mrf.mxu2 }
 0x235   : > { %878 = vrot.lane.b32.xlu0 %v2538_v44, %s2161_s30 }
 0x23a   : > { %884 = vrot.lane.b32.xlu2 %v2538_v44, %s2160_s23 }
 0x23b   : > { %881 = vrot.lane.b32.xlu1 %v2538_v44, %s2162_s26 }
 0x28d   : > { %v1086_v58 = vpop.xlane.xlu2 %1085 }
 0x28e   : > { %v1092_v59 = vsub.f32 %v1055_v46, %v1086_v58 }
 0x290   : > { %v1098_v60 = vmul.f32 1.442695, %v1092_v59 }
 0x292   : > { %1811 = vpow2.f32 %v1098_v60 }
 0x294   : > { %v1080_v61 = vpop.xlane.xlu0 %1079 }
 0x295   : > { %v1089_v62 = vpop.xlane.xlu1 %1088  ;;  %v1090_v63 = vsub.f32 %v1017_v49, %v1080_v61  ;;  %v1083_v0 = vpop.xlane.xlu2 %1082 }
 0x296   : > { %v1093_v1 = vsub.f32 %v1074_v51, %v1089_v62  ;;  %v1091_v3 = vsub.f32 %v1036_v48, %v1083_v0 }
 0x297   : > { %v1094_v2 = vmul.f32 1.442695, %v1090_v63 }
 0x298   : > { %v2550_v4 = vpop.eup %1811  ;;  %v1100_v6 = vmul.f32 1.442695, %v1093_v1  ;;  %v1096_v8 = vmul.f32 1.442695, %v1091_v3 }
 0x299   : > { %1813 = vpow2.f32 %v1094_v2  ;;  %v1108_v7 = vsel %vm1001_vm3, %v2550_v4, 0.0 }
 0x29a   : > { %1815 = vpow2.f32 %v1100_v6  ;;  %1109 = vadd.xlane.f32.xlu2 %v1108_v7 }
 0x29b   : > { %1817 = vpow2.f32 %v1096_v8 }
 0x29d   : > { %v885_v14 = vpop.permute.xlu2 %884 }
 0x29e   : > { %v899_v16 = vrot.slane %v885_v14, 4 }
 0x29f   : > { %v2554_v9 = vpop.eup %1813 }
 0x2a0   : > { %v2556_v10 = vpop.eup %1815  ;;  %v1102_v11 = vsel %vm1001_vm3, %v2554_v9, 0.0 }
 0x2a1   : > { %v1111_v12 = vsel %vm1001_vm3, %v2556_v10, 0.0  ;;  %1103 = vadd.xlane.f32.xlu0 %v1102_v11  ;;  %v2562_v13 = vpop.eup %1817 }
 0x2a2   : > { %1112 = vadd.xlane.f32.xlu1 %v1111_v12  ;;  %v1105_v18 = vsel %vm1001_vm3, %v2562_v13, 0.0 }
 0x2a7   : > { %v879_v15 = vpop.permute.xlu0 %878 }
 0x2a8   : > { %v901_v17 = vrot.slane %v879_v15, 4  ;;  %v900_v19 = vsel %vm639_vm2, %v899_v16, %v879_v15 }
 0x2a9   : > { %1106 = vadd.xlane.f32.xlu0 %v1105_v18  ;;  %v906_v23 = vperm.slane %v900_v19, %v2447_v28 }
 0x2aa   : > { %v902_v20 = vsel %vm639_vm2, %v885_v14, %v901_v17 }
 0x2ab   : > { %v910_v21 = vperm.slane %v902_v20, %v2447_v28  ;;  %v911_v31 = vrot.slane %v906_v23, 4 }
 0x2ad   : > { %v923_v24 = vrot.slane %v910_v21, 4  ;;  %v882_v25 = vpop.permute.xlu1 %881 }
 0x2ae   : > { %v887_v26 = vrot.slane %v882_v25, 4  ;;  %v890_v27 = vsel %vm639_vm2, %v882_v25, %v889_v22 }
 0x2af   : > { %v898_v29 = vperm.slane %v890_v27, %v2447_v28 }
 0x2b0   : > { %v888_v30 = vsel %vm639_vm2, %v887_v26, %v2538_v44 }
 0x2b1   : > { %v894_v32 = vperm.slane %v888_v30, %v2447_v28  ;;  %v924_v33 = vsel %vm639_vm2, %v923_v24, %v898_v29  ;;  %v925_v34 = vrot.slane %v898_v29, 4 }
 0x2b2   : > { %v930_v35 = vperm.slane %v924_v33, %v2456_v41 }
 0x2b3   : > { %v912_v36 = vsel %vm639_vm2, %v911_v31, %v894_v32  ;;  %v913_v37 = vrot.slane %v894_v32, 4  ;;  %v926_v38 = vsel %vm639_vm2, %v910_v21, %v925_v34 }
 0x2b4   : > { %v918_v39 = vperm.slane %v912_v36, %v2456_v41  ;;  %v934_v40 = vperm.slane %v926_v38, %v2456_v41  ;;  %v939_v44 = vrot.slane %v930_v35, 4 }
 0x2b5   : > { %v914_v42 = vsel %vm639_vm2, %v906_v23, %v913_v37 }
 0x2b6   : > { %v922_v43 = vperm.slane %v914_v42, %v2456_v41  ;;  %v941_v45 = vrot.slane %v934_v40, 4  ;;  %v935_v46 = vrot.slane %v918_v39, 4  ;;  %v940_v53 = vsel %vm639_vm2, 0.0, %v939_v44 }
 0x2b8   : > { %v937_v47 = vrot.slane %v922_v43, 4  ;;  %v942_v48 = vsel %vm639_vm2, 0.0, %v941_v45  ;;  %v954_v49 = vsel %vm639_vm2, %v941_v45, %v930_v35  ;;  %v936_v59 = vsel %vm639_vm2, 0.0, %v935_v46 }
 0x2b9   : > { %v958_v50 = vperm.slane %v954_v49, %v2447_v28  ;;  %v959_v51 = vrot.slane %v942_v48, 4 }
 0x2ba   : > { %v938_v52 = vsel %vm639_vm2, 0.0, %v937_v47  ;;  %v943_v54 = vsel %vm639_vm2, %v937_v47, %v918_v39 }
 0x2bb   : > { %v948_v55 = vrot.slane %v938_v52, 4  ;;  %v960_v56 = vsel %vm639_vm2, %v959_v51, %v940_v53  ;;  %v979_v57 = vrot.slane %v958_v50, 4  ;;  %v947_v58 = vperm.slane %v943_v54, %v2447_v28  ;;  %v1122_v52 = vld [vmem:[#allocation2] sm:$0xff] }
 0x2bc   : > { %v964_v60 = vperm.slane %v960_v56, %v2447_v28 }
 0x2bd   : > { %v949_v61 = vsel %vm639_vm2, %v948_v55, %v936_v59  ;;  %v967_v62 = vrot.slane %v947_v58, 4 }
 0x2be   : > { %v953_v63 = vperm.slane %v949_v61, %v2447_v28  ;;  %v980_v0 = vsel %vm639_vm2, %v964_v60, %v979_v57  ;;  %v977_v1 = vrot.slane %v964_v60, 4 }
 0x2bf   : > { %v988_v2 = vperm.slane %v980_v0, %v2456_v41 }
 0x2c0   : > { %v968_v3 = vsel %vm639_vm2, %v953_v63, %v967_v62  ;;  %v965_v6 = vrot.slane %v953_v63, 4  ;;  %v978_v7 = vsel %vm639_vm2, %v977_v1, %v958_v50 }
 0x2c1   : > { %v976_v8 = vperm.slane %v968_v3, %v2456_v41  ;;  %v993_v11 = vrot.slane %v988_v2, 4  ;;  %v984_v12 = vperm.slane %v978_v7, %v2456_v41 }
 0x2c2   : > { %v966_v14 = vsel %vm639_vm2, %v965_v6, %v947_v58 }
 0x2c3   : > { %v994_v15 = vsel %vm639_vm2, %v993_v11, %v976_v8  ;;  %v972_v16 = vperm.slane %v966_v14, %v2456_v41  ;;  %v989_v17 = vrot.slane %v984_v12, 4  ;;  %v995_v18 = vrot.slane %v976_v8, 4 }
 0x2c4   : > { %v999_v19 = vpack.c.bf16 %v994_v15, %v994_v15 }
 0x2c5   : > { %v990_v20 = vsel %vm639_vm2, %v989_v17, %v972_v16  ;;  %v991_v21 = vrot.slane %v972_v16, 4  ;;  %v996_v22 = vsel %vm639_vm2, %v988_v2, %v995_v18 }
 0x2c6   : > { %v1179_v23 = vsel %vm1139_vm4, %v999_v19, 0  ;;  %v997_v24 = vpack.c.bf16 %v990_v20, %v990_v20  ;;  %v1000_v25 = vpack.c.bf16 %v996_v22, %v996_v22 }
 0x2c7   : > { %1188 = vmatpush.bf16.msra.mxu1 %v1179_v23  ;;  %v992_v26 = vsel %vm639_vm2, %v984_v12, %v991_v21 }
 0x2c8   : > { %v1141_v27 = vsel %vm1139_vm4, %v997_v24, 0  ;;  %v1198_v29 = vsel %vm1139_vm4, %v1000_v25, 0  ;;  %v998_v30 = vpack.c.bf16 %v992_v26, %v992_v26 }
 0x2c9   : > { %1150 = vmatpush.bf16.msrb.mxu3 %v1141_v27  ;;  %1207 = vmatpush.bf16.msra.mxu2 %v1198_v29 }
 0x2ca   : > { %v1160_v31 = vsel %vm1139_vm4, %v998_v30, 0 }
 0x2cb   : > { %1169 = vmatpush.bf16.msra.mxu0 %v1160_v31 }
 0x30d   : > { %v1110_v32 = vpop.xlane.xlu2 %1109 }
 0x30e   : > { %1819 = vrcp.f32 %v1110_v32 }
 0x314   : > { %v1820_v33 = vpop.eup %1819  ;;  %v1104_v34 = vpop.xlane.xlu0 %1103 }
 0x315   : > { %v1120_v35 = vmul.f32 %v1820_v33, %v2550_v4  ;;  %v1113_v36 = vpop.xlane.xlu1 %1112  ;;  %1821 = vrcp.f32 %v1104_v34 }
 0x316   : > { %1823 = vrcp.f32 %v1113_v36 }
 0x317   : > { %v1134_v37 = vpack.c.bf16 %v1120_v35, %v1120_v35 }
 0x319   : > { %1667 = vmatmul.msk.bf16.vlgmr.msra.gmra.mxu1 %vm1001_vm3, %v1134_v37 }
 0x31b   : > { %v1822_v38 = vpop.eup %1821 }
 0x31c   : > { %v1824_v39 = vpop.eup %1823  ;;  %v1118_v40 = vmul.f32 %v1822_v38, %v2554_v9  ;;  %v1107_v42 = vpop.xlane.xlu0 %1106  ;;  %v1126_v9 = vsel %vm1001_vm3, %v1120_v35, 0.0 }
 0x31d   : > { %v1121_v43 = vmul.f32 %v1824_v39, %v2556_v10  ;;  %1825 = vrcp.f32 %v1107_v42 }
 0x31e   : > { %v1132_v44 = vpack.c.bf16 %v1118_v40, %v1118_v40  ;;  %v1123_v47 = vsel %vm1001_vm3, %v1118_v40, 0.0 }
 0x31f   : > { %v1135_v45 = vpack.c.bf16 %v1121_v43, %v1121_v43  ;;  %v1128_v51 = vsel %vm1001_vm3, %v1121_v43, 0.0 }
 0x320   : > { %1665 = vmatmul.msk.bf16.vlgmr.msrb.gmra.mxu3 %vm1001_vm3, %v1132_v44 }
 0x321   : > { %1668 = vmatmul.msk.bf16.vlgmr.msra.gmra.mxu2 %vm1001_vm3, %v1135_v45 }
 0x323   : > { %v1826_v4 = vpop.eup %1825 }
 0x324   : > { %v1119_v46 = vmul.f32 %v1826_v4, %v2562_v13 }
 0x326   : > { %v1124_v48 = vsel %vm1001_vm3, %v1119_v46, 0.0  ;;  %v1133_v49 = vpack.c.bf16 %v1119_v46, %v1119_v46 }
 0x327   : > { %v1125_v50 = vadd.f32 %v1124_v48, %v1123_v47 }
 0x328   : > { %1666 = vmatmul.msk.bf16.vlgmr.msra.gmra.mxu0 %vm1001_vm3, %v1133_v49 }
 0x329   : > { %v1127_v10 = vadd.f32 %v1126_v9, %v1125_v50 }
 0x32b   : > { %v1129_v53 = vadd.f32 %v1128_v51, %v1127_v10 }
 0x32d   : > { %v1130_v54 = vadd.f32 %v1129_v53, %v1122_v52 }
 0x32f   : > { %1131 = vst.msk [vmem:[#allocation2] sm:$0xff] %vm1001_vm3, %v1130_v54 }
 0x396   : > { %v1190_v55 = vpop.f32.mrf.mxu1 }
 0x397   : > { %v1213_v56 = vrot.slane %v1190_v55, 4 }
 0x39e   : > { %v1192_v13 = vpop.f32.mrf.mxu1 }
 0x3a3   : > { %v1152_v57 = vpop.f32.mrf.mxu3 }
 0x3a4   : > { %v1214_v58 = vsel %vm639_vm2, %v1213_v56, %v1152_v57  ;;  %v1215_v59 = vrot.slane %v1152_v57, 4  ;;  %v1209_v60 = vpop.f32.mrf.mxu2 }
 0x3a5   : > { %v1220_v61 = vperm.slane %v1214_v58, %v2447_v28  ;;  %v1225_v62 = vrot.slane %v1209_v60, 4  ;;  %v1171_v63 = vpop.f32.mrf.mxu0 }
 0x3a6   : > { %v1216_v0 = vsel %vm639_vm2, %v1190_v55, %v1215_v59  ;;  %v1227_v1 = vrot.slane %v1171_v63, 4 }
 0x3a7   : > { %v1224_v2 = vperm.slane %v1216_v0, %v2447_v28  ;;  %v1239_v3 = vrot.slane %v1220_v61, 4  ;;  %v1226_v6 = vsel %vm639_vm2, %v1225_v62, %v1171_v63  ;;  %v1692_v62 = vld [vmem:[#allocation14 + $0x8] sm:$0xff]  ;;  %v1691_v63 = vld [vmem:[#allocation14] sm:$0xff] }
 0x3a8   : > { %v1228_v7 = vsel %vm639_vm2, %v1209_v60, %v1227_v1  ;;  %v1232_v8 = vperm.slane %v1226_v6, %v2447_v28  ;;  %1366 = vmatpush.bf16.msra.mxu3 %v1692_v62 }
 0x3a9   : > { %v1251_v11 = vrot.slane %v1224_v2, 4  ;;  %v1236_v12 = vperm.slane %v1228_v7, %v2447_v28 }
 0x3aa   : > { %v1237_v14 = vrot.slane %v1232_v8, 4  ;;  %v1240_v15 = vsel %vm639_vm2, %v1232_v8, %v1239_v3 }
 0x3ab   : > { %v1248_v16 = vperm.slane %v1240_v15, %v2456_v41  ;;  %v1249_v17 = vrot.slane %v1236_v12, 4  ;;  %v1252_v18 = vsel %vm639_vm2, %v1236_v12, %v1251_v11  ;;  %v1154_v19 = vpop.f32.mrf.mxu3  ;;  %v2168_v15 = vmov 32.0  }
 0x3ac   : > { %v1238_v20 = vsel %vm639_vm2, %v1237_v14, %v1220_v61  ;;  %v1260_v21 = vperm.slane %v1252_v18, %v2456_v41  ;;  %v1211_v22 = vpop.f32.mrf.mxu2  ;;  %1367 = vmatpush.bf16.msra.mxu3 %v1691_v63  ;;  %1827 = vrcp.f32 %v2168_v15 }
 0x3ad   : > { %v1244_v23 = vperm.slane %v1238_v20, %v2456_v41  ;;  %v1250_v24 = vsel %vm639_vm2, %v1249_v17, %v1224_v2  ;;  %v1263_v25 = vrot.slane %v1248_v16, 4  ;;  %v1173_v26 = vpop.f32.mrf.mxu0 }
 0x3ae   : > { %v1256_v27 = vperm.slane %v1250_v24, %v2456_v41  ;;  %v1267_v29 = vrot.slane %v1260_v21, 4 }
 0x3af   : > { %v1261_v30 = vrot.slane %v1244_v23, 4  ;;  %v1264_v31 = vsel %vm639_vm2, 0.0, %v1263_v25  ;;  %v1269_v32 = vsel %vm639_vm2, %v1263_v25, %v1244_v23 }
 0x3b0   : > { %v1265_v33 = vrot.slane %v1256_v27, 4  ;;  %v1268_v34 = vsel %vm639_vm2, 0.0, %v1267_v29  ;;  %v1273_v35 = vperm.slane %v1269_v32, %v2447_v28  ;;  %v1274_v36 = vrot.slane %v1264_v31, 4 }
 0x3b1   : > { %v1262_v37 = vsel %vm639_vm2, 0.0, %v1261_v30  ;;  %v1285_v38 = vrot.slane %v1268_v34, 4  ;;  %v1280_v39 = vsel %vm639_vm2, %v1267_v29, %v1256_v27 }
 0x3b2   : > { %v1266_v40 = vsel %vm639_vm2, 0.0, %v1265_v33  ;;  %v1275_v42 = vsel %vm639_vm2, %v1274_v36, %v1262_v37  ;;  %v1284_v43 = vperm.slane %v1280_v39, %v2447_v28  ;;  %v1293_v44 = vrot.slane %v1273_v35, 4  ;;  %v1828_v16 = vpop.eup %1827  ;;  %v1809_v36 = vld [vmem:[%s2732_s7] ss:$0 sm:$0xff] }
 0x3b3   : > { %v1279_v45 = vperm.slane %v1275_v42, %v2447_v28  ;;  %v1286_v4 = vsel %vm639_vm2, %v1285_v38, %v1266_v40  ;;  %v1377_v17 = vmul.f32 32.0, %v1828_v16  ;;  %vm1381_vm7 = vweird.f32 %v1828_v16  ;;  %v1810_v38 = vld [vmem:[%s2733_s8] ss:$0 sm:$0xff] }
 0x3b4   : > { %v1290_v46 = vperm.slane %v1286_v4, %v2447_v28  ;;  %v1305_v47 = vrot.slane %v1284_v43, 4 }
 0x3b5   : > { %v1294_v48 = vsel %vm639_vm2, %v1279_v45, %v1293_v44  ;;  %v1291_v49 = vrot.slane %v1279_v45, 4  ;;  %v1378_v18 = vsub.f32 1.0, %v1377_v17 }
 0x3b6   : > { %v1302_v50 = vperm.slane %v1294_v48, %v2456_v41  ;;  %v1306_v9 = vsel %vm639_vm2, %v1290_v46, %v1305_v47  ;;  %v1303_v10 = vrot.slane %v1290_v46, 4 }
 0x3b7   : > { %v1314_v51 = vperm.slane %v1306_v9, %v2456_v41  ;;  %v1292_v52 = vsel %vm639_vm2, %v1291_v49, %v1273_v35  ;;  %v1379_v19 = vmul.f32 %v1828_v16, %v1378_v18 }
 0x3b8   : > { %v1321_v53 = vrot.slane %v1302_v50, 4  ;;  %v1298_v54 = vperm.slane %v1292_v52, %v2456_v41  ;;  %v1304_v55 = vsel %vm639_vm2, %v1303_v10, %v1284_v43 }
 0x3b9   : > { %v1319_v13 = vrot.slane %v1314_v51, 4  ;;  %v1310_v28 = vperm.slane %v1304_v55, %v2456_v41  ;;  %v1380_v20 = vadd.f32 %v1828_v16, %v1379_v19 }
 0x3ba   : > { %v1322_v56 = vsel %vm639_vm2, %v1314_v51, %v1321_v53  ;;  %v1317_v57 = vrot.slane %v1298_v54, 4 }
 0x3bb   : > { %1332 = vrot.lane.b32.xlu2 %v1322_v56, %s2165_s16  ;;  %v1320_v58 = vsel %vm639_vm2, %v1319_v13, %v1302_v50  ;;  %v1315_v59 = vrot.slane %v1310_v28, 4  ;;  %v1382_v21 = vsel %vm1381_vm7, %v1828_v16, %v1380_v20 }
 0x3bc   : > { %1328 = vrot.lane.b32.xlu0 %v1320_v58, %s2166_s1  ;;  %v1318_v60 = vsel %vm639_vm2, %v1310_v28, %v1317_v57 }
 0x3bd   : > { %1324 = vrot.lane.b32.xlu1 %v1318_v60, %s2167_s6  ;;  %v1316_v61 = vsel %vm639_vm2, %v1315_v59, %v1298_v54 }
 0x415   : > { %v1333_v2 = vpop.permute.xlu2 %1332 }
 0x42e   : > { %v1329_v41 = vpop.permute.xlu0 %1328 }
 0x42f   : > { %v1325_v0 = vpop.permute.xlu1 %1324 }
 0x430   : > { %v1335_v1 = vsel %vm1001_vm3, %v1316_v61, %v1325_v0 }
 0x431   : > { %v1337_v3 = vsel %vm1336_vm5, %v1335_v1, %v1329_v41 }
 0x432   : > { %v1339_v6 = vsel %vm1338_vm6, %v1337_v3, %v1333_v2 }
 0x433   : > { %v1340_v7 = vpack.c.bf16 %v1339_v6, %v1339_v6 }
 0x435   : > { %1677 = vmatmul.msk.bf16.vlgmr.msra.gmra.mxu3 %vm542_vm1, %v1340_v7 }
 0x4b8   : > { %v1369_v8 = vpop.f32.mrf.mxu3 }
 0x4b9   : > { %v1370_v11 = vadd.f32 %v1369_v8, %v2431_v5 }
 0x4bb   : > { %v1373_v12 = vsel %vm542_vm1, %v1370_v11, 0.0 }
 0x4bc   : > { %1374 = vadd.xlane.f32.xlu0 %v1373_v12 }
 0x4c0   : > { %v1371_v14 = vpop.f32.mrf.mxu3 }
 0x52f   : > { %v1375_v22 = vpop.xlane.xlu0 %1374 }
 0x530   : > { %v1383_v23 = vmul.f32 %v1382_v21, %v1375_v22 }
 0x532   : > { %v1384_v24 = vsub.f32 %v1370_v11, %v1383_v23 }
 0x534   : > { %v1385_v25 = vmul.f32 %v1384_v24, %v1384_v24 }
 0x536   : > { %v1386_v26 = vsel %vm542_vm1, %v1385_v25, 0.0 }
 0x537   : > { %1387 = vadd.xlane.f32.xlu1 %v1386_v26 }
 0x5aa   : > { %v1388_v5 = vpop.xlane.xlu1 %1387 }
 0x5ab   : > { %v1389_v27 = vmul.f32 %v1388_v5, %v1382_v21 }
 0x5ad   : > { %v1390_v29 = vadd.f32 1e-05, %v1389_v27 }
 0x5af   : > { %1829 = vrsqrt.f32 %v1390_v29  ;;  %vm1397_vm9 = vweird.f32 %v1390_v29 }
 0x5b5   : > { %v1830_v30 = vpop.eup %1829 }
 0x5b6   : > { %v1392_v31 = vmul.f32 %v1830_v30, %v1390_v29  ;;  %vm1398_vm8 = vweird.f32 %v1830_v30 }
 0x5b7   : > { %vm1399_vm10 = vmor %vm1397_vm9, %vm1398_vm8 }
 0x5b8   : > { %v1393_v32 = vmul.f32 %v1830_v30, %v1392_v31 }
 0x5ba   : > { %v1394_v33 = vmul.f32 0.5, %v1393_v32 }
 0x5bc   : > { %v1395_v34 = vsub.f32 1.5, %v1394_v33 }
 0x5be   : > { %v1396_v35 = vmul.f32 %v1830_v30, %v1395_v34 }
 0x5c0   : > { %v1400_v37 = vsel %vm1399_vm10, %v1830_v30, %v1396_v35 }
 0x5c1   : > { %v1401_v39 = vmul.f32 %v1400_v37, %v1384_v24 }
 0x5c3   : > { %v1406_v40 = vmul.f32 %v1809_v36, %v1401_v39  ;;  %1416 = sbr.rel (%p1678_p13) target bundleno = 1484 (0x5cc), region = 92 }
 0x5c5   : > { %v1411_v42 = vadd.f32 %v1810_v38, %v1406_v40 }
 0x5c7   : > { %1412 = vst.msk [vmem:[%s514_s18] sm:$0xff] %vm542_vm1, %v1411_v42 }
 0x5c8   : > { %v1417_v43 = vld [vmem:[#allocation2] sm:$0xff] }
 0x5c9   : > { %v1418_v44 = vmul.f32 0.125, %v1417_v43 }
 0x5cb   : > { %1419 = vst.msk [vmem:[#allocation16] sm:$0xff] %vm1001_vm3, %v1418_v44 }
 0x5cc PF: > { %s1680_s11 = sshll.u32 %s2249_s20, 3  ;;  %s1433_s21 = sshll.u32 %s514_s18, 4  ;;  %s1434_s21 = int_to_ptr.vmem [resolvable:$true] %s1433_s21 }
 0x5cd   : > { %s1431_s19 = scalar_lea.hbm %s2734_s9, %s1680_s11  ;;  %s1421_s12 = scalar_lea.sflag [#allocation5], %s2402_s28 }
 0x5ce   : > { %s1435_s24 = sshll.u32 %s1431_s19, 4  ;;  %s2061_s16 = scalar_lea.hbm %s2734_s9, 16  ;;  %s1436_s24 = int_to_ptr.hbm [resolvable:$true] %s1435_s24 }
 0x5cf   : > { %s2055_s13 = sshra.s32 %s1436_s24, 4  ;;  %s2056_s13 = int_to_ptr.hbm [resolvable:$true] %s2055_s13 }
 0x5d0   : > { %s2057_s23 = scalar_lea.hbm %s2056_s13, 8  ;;  %p2062_p7 = scmp.lt.s32.totalorder %s2056_s13, %s2734_s9 }
 0x5d1   : > { %p2058_p1 = scmp.ne.s32.totalorder %s2056_s13, %s2057_s23  ;;  %p2063_p11 = scmp.lt.s32.totalorder %s2061_s16, %s2057_s23 }
 0x5d3   : > { %p2059_p0 = pnand %p2058_p1, %p2307_p6  ;;  %p2064_p12 = por %p2063_p11, %p2062_p7 }
 0x5d5   : > { %p2060_p9 = pneg %p2059_p0 }
 0x5d7   : > { %p2065_p4 = pnand %p2064_p12, %p2060_p9 }
 0x5d9   : > { %2068 = shalt.err (!%p2065_p4)
}
 0x5da   : > { %1715 = dma.vmem_to_hbm [thread:$0]  (%p2307_p6), %s1434_s21, 128, %s1436_s24, %s1421_s12  }
 0x5db   : > { %s2169_s28 = smov [#allocation16]   ;;  %s1447_s27 = sshll.u32 %s2735_s10, 4  ;;  %s1448_s27 = int_to_ptr.hbm [resolvable:$true] %s1447_s27 }
 0x5dc   : > { %s1445_s29 = sshll.u32 %s2169_s28, 4  ;;  %p2777_p8 = scmp.eq.s32.totalorder %s2249_s20, 1  ;;  %s1446_s29 = int_to_ptr.vmem [resolvable:$true] %s1445_s29 }
 0x5de   : > { %1717 = dma.vmem_to_hbm [thread:$0]  (%p2777_p8), %s1446_s29, 128, %s1448_s27, [#allocation17]  }
 0x5df   : > { %p2778_p10 = pmov %p2777_p8 }
 0x5e0   : > { %p2779_p2 = pmov %p2777_p8 }
 0x5e1   : > { %2130 = dma.done.wait (%p2778_p10), [#allocation17], 128  }
 0x5e2   : > { %2132 = vsyncadd (%p2779_p2), [#allocation17], 4294967168 }
 0x5e3 PF: > { %s2780_s25 = sld [smem:[#allocation24_spill]] }
 0x5e4   : > { %s2782_s4 = sld [smem:[#allocation25_spill]] }
 0x5e9   : > { %s1464_s11 = sand.u32 1, %s2780_s25  }
 0x5ea   : > { %p2783_p6 = scmp.ge.s32.totalorder %s2782_s4, 2  ;;  %s1465_s17 = scalar_lea.sflag [#allocation5], %s1464_s11 }
 0x5ec   : > { %p1745_p5 = pnand %p2783_p6, %p2311_p3 }
 0x5ee   : > { %p1746_p13 = pneg %p1745_p5 }
 0x5f0   : > { %2134 = dma.done.wait (%p1746_p13), %s1465_s17, 128  }
 0x5f1   : > { %2136 = vsyncadd (%p1746_p13), %s1465_s17, 4294967168  ;;  %s2784_s16 = sld [smem:[#allocation26_spill]]  ;;  %s2786_s13 = smov %s2143_s14 }
 0x5f2   : > { %s2785_s5 = sld [smem:[#allocation27_spill]]  ;;  %s2787_s14 = smov %s2147_s15 }
 0x5f7   : > { %p30_p1 = scmp.ge.s32.totalorder %s2784_s16, 4  }
 0x5f8   : > { %s2788_s15 = smov %s2785_s5 }
 0x5f9   :  { %32 = sbr.rel (!%p30_p1) target bundleno = 16 (0x10), region = 157 }
 0x5fe   :  { %1471 = vsyncpa [#allocation4], 1 }
 0x5ff   :  { %1473 = vsyncpa [#allocation4 + $0x1], 1 }
 0x600   :  { %1474 = vsyncpa [#allocation7], 1 }
 0x601   :  { %1476 = vsyncpa [#allocation7 + $0x1], 1 }
 0x602   :  { %1477 = vsyncpa [#allocation10], 1 }
 0x603   :  { %1478 = vsyncpa [#allocation13], 1 }
 0x604   :  { %1479 = vsyncpa [#allocation5], 1 }
 0x605   :  { %1481 = vsyncpa [#allocation5 + $0x1], 1 }
 0x606   :  { %1482 = vsyncpa [#allocation17], 1 }

</bundles_post_ra>
